<compile_context>
chip_gen: v7x
topology: tpu7x:2x2x1
jax: 0.10.0
libtpu: 0.0.40
codegen_flags: <defaults>
</compile_context>

<pallas_src>
import jax
import jax.numpy as jnp
from jax.experimental import pallas as pl
from jax.experimental.pallas import tpu as pltpu

IN_FEATURES = 2
HIDDEN = 100
OUT_FEATURES = 6
HIDDEN_PAD = 128   # lane-width padded hidden size
OUT_PAD = 8        # stored output width (6 real + 2 zero pad) -- NOT 128


def _round_up(n, m):
    return ((n + m - 1) // m) * m


def _cdiv(a, b):
    return (a + b - 1) // b


def _mlp_kernel(xy_ref,
                w1a_ref, w1b_ref, b1_ref,
                w2_ref, b2_ref,
                w5_ref, b5_ref,
                w6_ref, b6_ref,
                out_ref):
    # Layer 1 (K=2) on the VPU: two broadcast FMAs, no MXU pass wasted.
    xy = xy_ref[...]                                          # (TM, 2) f32
    x = xy[:, 0:1]                                            # (TM, 1)
    y = xy[:, 1:2]                                            # (TM, 1)
    h = x * w1a_ref[...] + y * w1b_ref[...] + b1_ref[...]     # (TM, 128) f32
    h = jnp.maximum(h, 0.0)

    def dense(h_f32, w_ref, b_ref, relu):
        # Matmul in the weights' dtype (bf16 by default, f32 optional), f32
        # accumulation; bias-add / ReLU stay f32 (portable to v5e's f32 VPU).
        o = jnp.dot(h_f32.astype(w_ref.dtype), w_ref[...],
                    preferred_element_type=jnp.float32) + b_ref[...]
        return jnp.maximum(o, 0.0) if relu else o

    h = dense(h, w2_ref, b2_ref, relu=True)                   # (TM, 128)
    h = dense(h, w5_ref, b5_ref, relu=True)                   # (TM, 128)
    o = dense(h, w6_ref, b6_ref, relu=False)                  # (TM, 128)
    # Store only the 8 leading lanes (6 real outputs + 2 exact zeros):
    # 16x less HBM write traffic than a 128-wide padded slab.
    out_ref[...] = o[:, :OUT_PAD].astype(out_ref.dtype)


def prepare_params(params, use_bf16=True):
    """One-time padding/casting of weights (hoisted out of the forward path).

    params: [(w1,b1),(w2,b2),(w5,b5),(w6,b6)] with w as (in,out), b as (1,out).
    Returns padded arrays: layer 1 kept in f32 (VPU path), layers 2/5/6 cast
    to bf16 for the MXU when use_bf16=True (default).  Zero padding keeps the
    math exact.
    """
    (w1, b1), (w2, b2), (w5, b5), (w6, b6) = params
    hp = HIDDEN_PAD - HIDDEN
    op = HIDDEN_PAD - OUT_FEATURES          # matmul done at 128 lanes, sliced to 8
    f32 = jnp.float32
    mm = jnp.bfloat16 if use_bf16 else jnp.float32

    w1p = jnp.pad(w1.astype(f32), ((0, 0), (0, hp)))          # (2, 128)
    b1p = jnp.pad(b1.astype(f32), ((0, 0), (0, hp)))          # (1, 128)
    w1a = w1p[0:1, :]                                         # (1, 128)
    w1b = w1p[1:2, :]                                         # (1, 128)

    w2p = jnp.pad(w2.astype(f32), ((0, hp), (0, hp))).astype(mm)   # (128, 128)
    b2p = jnp.pad(b2.astype(f32), ((0, 0), (0, hp)))               # (1, 128) f32
    w5p = jnp.pad(w5.astype(f32), ((0, hp), (0, hp))).astype(mm)
    b5p = jnp.pad(b5.astype(f32), ((0, 0), (0, hp)))
    w6p = jnp.pad(w6.astype(f32), ((0, hp), (0, op))).astype(mm)   # (128, 128)
    b6p = jnp.pad(b6.astype(f32), ((0, 0), (0, op)))               # (1, 128) f32
    return (w1a, w1b, b1p, w2p, b2p, w5p, b5p, w6p, b6p)


def rans_model_forward(x, y, prepared, *, tile_m=2048):
    """Pallas equivalent of ransModel.forward(x, y) using prepare_params output.

    x, y: (N, 1) columns.  Returns (N, 6) float32.
    """
    n = x.shape[0]
    w1a, w1b, b1p, w2p, b2p, w5p, b5p, w6p, b6p = prepared

    xy = jnp.concatenate((x, y), axis=1).astype(jnp.float32)  # (N, 2)

    # Batch tile: big (amortizes ~0.35us/step + DMA setup), but clamped so the
    # grid has >= 2 steps whenever possible (v7x has 2 TensorCores).
    n_pad8 = _round_up(n, 8)
    half = _round_up(_cdiv(n_pad8, 2), 8)
    tm = max(8, min(tile_m, half))
    n_pad = _round_up(n, tm)
    xy = jnp.pad(xy, ((0, n_pad - n), (0, 0)))

    def full_block(arr):
        # Small weights/biases: single full-array block, constant index map
        # -> VMEM-resident across all grid steps.
        return pl.BlockSpec(arr.shape, lambda i: (0, 0))

    grid = (n_pad // tm,)
    out = pl.pallas_call(
        _mlp_kernel,
        out_shape=jax.ShapeDtypeStruct((n_pad, OUT_PAD), jnp.float32),
        grid_spec=pltpu.PrefetchScalarGridSpec(
            num_scalar_prefetch=0,
            grid=grid,
            in_specs=[
                pl.BlockSpec((tm, IN_FEATURES), lambda i: (i, 0)),   # merged x|y
                full_block(w1a), full_block(w1b), full_block(b1p),
                full_block(w2p), full_block(b2p),
                full_block(w5p), full_block(b5p),
                full_block(w6p), full_block(b6p),
            ],
            out_specs=pl.BlockSpec((tm, OUT_PAD), lambda i: (i, 0)),
        ),
        compiler_params=pltpu.CompilerParams(
            dimension_semantics=("parallel",),
            vmem_limit_bytes=32 * 1024 * 1024),
    )(xy, w1a, w1b, b1p, w2p, b2p, w5p, b5p, w6p, b6p)

    return out[:n, :OUT_FEATURES]


def rans_model_apply(x, y, params, *, tile_m=2048, use_bf16=True):
    """Convenience wrapper: pads/casts params then runs the kernel."""
    return rans_model_forward(x, y, prepare_params(params, use_bf16),
                              tile_m=tile_m)


def init_params(key):
    """Deterministic init mimicking nn.Linear's U(-1/sqrt(fan_in), 1/sqrt(fan_in)).

    Weights stored as (in_features, out_features); biases as (1, out_features).
    """
    dims = [(IN_FEATURES, HIDDEN), (HIDDEN, HIDDEN), (HIDDEN, HIDDEN),
            (HIDDEN, OUT_FEATURES)]
    params = []
    for (fan_in, fan_out) in dims:
        key, kw, kb = jax.random.split(key, 3)
        bound = 1.0 / jnp.sqrt(fan_in)
        w = jax.random.uniform(kw, (fan_in, fan_out), jnp.float32, -bound, bound)
        b = jax.random.uniform(kb, (1, fan_out), jnp.float32, -bound, bound)
        params.append((w, b))
    return params


def rans_model_reference(x, y, params):
    """Pure-JAX reference (mirrors the PyTorch forward)."""
    h = jnp.concatenate((x, y), axis=1)
    (w1, b1), (w2, b2), (w5, b5), (w6, b6) = params
    h = jnp.maximum(h @ w1 + b1, 0.0)
    h = jnp.maximum(h @ w2 + b2, 0.0)
    h = jnp.maximum(h @ w5 + b5, 0.0)
    return h @ w6 + b6


if __name__ == "__main__":
    key = jax.random.PRNGKey(0)
    k_params, kx, ky = jax.random.split(key, 3)
    params = init_params(k_params)

    # Prepared (padded / cast) params are built ONCE and reused across calls.
    prepared_f32 = prepare_params(params, use_bf16=False)
    prepared_bf16 = prepare_params(params, use_bf16=True)

    # Small batch, deliberately not a multiple of 8 -> exercises row padding
    # and the >=2-grid-steps clamp.  f32 path must match reference tightly.
    N = 13
    x = jax.random.normal(kx, (N, 1), jnp.float32)
    y = jax.random.normal(ky, (N, 1), jnp.float32)
    ref = rans_model_reference(x, y, params)
    out = jax.block_until_ready(rans_model_forward(x, y, prepared_f32))
    assert out.shape == (N, OUT_FEATURES)
    assert jnp.allclose(out, ref, atol=1e-4, rtol=1e-4), "f32 mismatch vs reference"

    # Larger batch, multi-step grid ("parallel" -> megacore-shardable on v7x),
    # default bf16 MXU path; loose tolerance vs the f32 reference.
    N2 = 256
    x2 = jax.random.normal(kx, (N2, 1), jnp.float32)
    y2 = jax.random.normal(ky, (N2, 1), jnp.float32)
    ref2 = rans_model_reference(x2, y2, params)
    out2 = jax.block_until_ready(
        rans_model_forward(x2, y2, prepared_bf16, tile_m=64))   # grid = 4 steps
    assert out2.shape == (N2, OUT_FEATURES)
    assert jnp.allclose(out2, ref2, atol=2e-1, rtol=2e-1), "bf16 mismatch"

    # Default-tile path (tile clamp picks tm=128 -> 2 grid steps here).
    out3 = jax.block_until_ready(rans_model_forward(x2, y2, prepared_f32))
    assert jnp.allclose(out3, ref2, atol=1e-4, rtol=1e-4), "default-tile f32 mismatch"

    print("KERNEL_OK")
</pallas_src>

<mosaic_0001>
module attributes {stable_mosaic.version = 11 : i64} {
  func.func @_mlp_kernel(%arg0: i32, %arg1: memref<8x2xf32, #tpu.memory_space<vmem>>, %arg2: memref<1x128xf32, #tpu.memory_space<vmem>>, %arg3: memref<1x128xf32, #tpu.memory_space<vmem>>, %arg4: memref<1x128xf32, #tpu.memory_space<vmem>>, %arg5: memref<128x128xf32, #tpu.memory_space<vmem>>, %arg6: memref<1x128xf32, #tpu.memory_space<vmem>>, %arg7: memref<128x128xf32, #tpu.memory_space<vmem>>, %arg8: memref<1x128xf32, #tpu.memory_space<vmem>>, %arg9: memref<128x128xf32, #tpu.memory_space<vmem>>, %arg10: memref<1x128xf32, #tpu.memory_space<vmem>>, %arg11: memref<8x8xf32, #tpu.memory_space<vmem>>) attributes {dimension_semantics = [#tpu.dimension_semantics<parallel>], iteration_bounds = array<i64: 2>, scalar_prefetch = 0 : i64, scratch_operands = 0 : i64, tpu.core_type = #tpu.core_type<tc>, window_params = [{transform_indices = @transform_0, window_bounds = array<i64: 8, 2>}, {pipeline_mode = #tpu.pipeline_mode<synchronous>, transform_indices = @transform_1, window_bounds = array<i64: 1, 128>}, {pipeline_mode = #tpu.pipeline_mode<synchronous>, transform_indices = @transform_2, window_bounds = array<i64: 1, 128>}, {pipeline_mode = #tpu.pipeline_mode<synchronous>, transform_indices = @transform_3, window_bounds = array<i64: 1, 128>}, {pipeline_mode = #tpu.pipeline_mode<synchronous>, transform_indices = @transform_4, window_bounds = array<i64: 128, 128>}, {pipeline_mode = #tpu.pipeline_mode<synchronous>, transform_indices = @transform_5, window_bounds = array<i64: 1, 128>}, {pipeline_mode = #tpu.pipeline_mode<synchronous>, transform_indices = @transform_6, window_bounds = array<i64: 128, 128>}, {pipeline_mode = #tpu.pipeline_mode<synchronous>, transform_indices = @transform_7, window_bounds = array<i64: 1, 128>}, {pipeline_mode = #tpu.pipeline_mode<synchronous>, transform_indices = @transform_8, window_bounds = array<i64: 128, 128>}, {pipeline_mode = #tpu.pipeline_mode<synchronous>, transform_indices = @transform_9, window_bounds = array<i64: 1, 128>}, {transform_indices = @transform_10, window_bounds = array<i64: 8, 8>}]} {
    %c0 = arith.constant 0 : index
    %c0_0 = arith.constant 0 : index
    %0 = vector.load %arg1[%c0, %c0_0] : memref<8x2xf32, #tpu.memory_space<vmem>>, vector<8x2xf32>
    %1 = vector.extract_strided_slice %0 {offsets = [0, 0], sizes = [8, 1], strides = [1, 1]} : vector<8x2xf32> to vector<8x1xf32>
    %2 = vector.extract_strided_slice %0 {offsets = [0, 1], sizes = [8, 1], strides = [1, 1]} : vector<8x2xf32> to vector<8x1xf32>
    %c0_1 = arith.constant 0 : index
    %c0_2 = arith.constant 0 : index
    %3 = vector.load %arg2[%c0_1, %c0_2] : memref<1x128xf32, #tpu.memory_space<vmem>>, vector<1x128xf32>
    %4 = vector.broadcast %1 : vector<8x1xf32> to vector<8x128xf32>
    %5 = vector.broadcast %3 : vector<1x128xf32> to vector<8x128xf32>
    %6 = arith.mulf %4, %5 : vector<8x128xf32>
    %c0_3 = arith.constant 0 : index
    %c0_4 = arith.constant 0 : index
    %7 = vector.load %arg3[%c0_3, %c0_4] : memref<1x128xf32, #tpu.memory_space<vmem>>, vector<1x128xf32>
    %8 = vector.broadcast %2 : vector<8x1xf32> to vector<8x128xf32>
    %9 = vector.broadcast %7 : vector<1x128xf32> to vector<8x128xf32>
    %10 = arith.mulf %8, %9 : vector<8x128xf32>
    %11 = arith.addf %6, %10 : vector<8x128xf32>
    %c0_5 = arith.constant 0 : index
    %c0_6 = arith.constant 0 : index
    %12 = vector.load %arg4[%c0_5, %c0_6] : memref<1x128xf32, #tpu.memory_space<vmem>>, vector<1x128xf32>
    %13 = vector.broadcast %12 : vector<1x128xf32> to vector<8x128xf32>
    %14 = arith.addf %11, %13 : vector<8x128xf32>
    %cst = arith.constant 0.000000e+00 : f32
    %15 = vector.broadcast %cst : f32 to vector<8x128xf32>
    %16 = arith.maximumf %14, %15 : vector<8x128xf32>
    %c0_7 = arith.constant 0 : index
    %c0_8 = arith.constant 0 : index
    %17 = vector.load %arg5[%c0_7, %c0_8] : memref<128x128xf32, #tpu.memory_space<vmem>>, vector<128x128xf32>
    %cst_9 = arith.constant dense<0.000000e+00> : vector<8x128xf32>
    %18 = tpu.matmul %16, %17, %cst_9 {dimension_numbers = #tpu.dot_dimension_numbers<[1], [0], [0], [1], [0, 0, 1, 1], [], []>} : vector<8x128xf32>, vector<128x128xf32>, vector<8x128xf32> -> vector<8x128xf32>
    %c0_10 = arith.constant 0 : index
    %c0_11 = arith.constant 0 : index
    %19 = vector.load %arg6[%c0_10, %c0_11] : memref<1x128xf32, #tpu.memory_space<vmem>>, vector<1x128xf32>
    %20 = vector.broadcast %19 : vector<1x128xf32> to vector<8x128xf32>
    %21 = arith.addf %18, %20 : vector<8x128xf32>
    %cst_12 = arith.constant 0.000000e+00 : f32
    %22 = vector.broadcast %cst_12 : f32 to vector<8x128xf32>
    %23 = arith.maximumf %21, %22 : vector<8x128xf32>
    %c0_13 = arith.constant 0 : index
    %c0_14 = arith.constant 0 : index
    %24 = vector.load %arg7[%c0_13, %c0_14] : memref<128x128xf32, #tpu.memory_space<vmem>>, vector<128x128xf32>
    %cst_15 = arith.constant dense<0.000000e+00> : vector<8x128xf32>
    %25 = tpu.matmul %23, %24, %cst_15 {dimension_numbers = #tpu.dot_dimension_numbers<[1], [0], [0], [1], [0, 0, 1, 1], [], []>} : vector<8x128xf32>, vector<128x128xf32>, vector<8x128xf32> -> vector<8x128xf32>
    %c0_16 = arith.constant 0 : index
    %c0_17 = arith.constant 0 : index
    %26 = vector.load %arg8[%c0_16, %c0_17] : memref<1x128xf32, #tpu.memory_space<vmem>>, vector<1x128xf32>
    %27 = vector.broadcast %26 : vector<1x128xf32> to vector<8x128xf32>
    %28 = arith.addf %25, %27 : vector<8x128xf32>
    %cst_18 = arith.constant 0.000000e+00 : f32
    %29 = vector.broadcast %cst_18 : f32 to vector<8x128xf32>
    %30 = arith.maximumf %28, %29 : vector<8x128xf32>
    %c0_19 = arith.constant 0 : index
    %c0_20 = arith.constant 0 : index
    %31 = vector.load %arg9[%c0_19, %c0_20] : memref<128x128xf32, #tpu.memory_space<vmem>>, vector<128x128xf32>
    %cst_21 = arith.constant dense<0.000000e+00> : vector<8x128xf32>
    %32 = tpu.matmul %30, %31, %cst_21 {dimension_numbers = #tpu.dot_dimension_numbers<[1], [0], [0], [1], [0, 0, 1, 1], [], []>} : vector<8x128xf32>, vector<128x128xf32>, vector<8x128xf32> -> vector<8x128xf32>
    %c0_22 = arith.constant 0 : index
    %c0_23 = arith.constant 0 : index
    %33 = vector.load %arg10[%c0_22, %c0_23] : memref<1x128xf32, #tpu.memory_space<vmem>>, vector<1x128xf32>
    %34 = vector.broadcast %33 : vector<1x128xf32> to vector<8x128xf32>
    %35 = arith.addf %32, %34 : vector<8x128xf32>
    %36 = vector.extract_strided_slice %35 {offsets = [0, 0], sizes = [8, 8], strides = [1, 1]} : vector<8x128xf32> to vector<8x8xf32>
    %c0_24 = arith.constant 0 : index
    %c0_25 = arith.constant 0 : index
    %37 = vector.load %arg11[%c0_24, %c0_25] : memref<8x8xf32, #tpu.memory_space<vmem>>, vector<8x8xf32>
    tpu.vector_store %arg11[%c0_24, %c0_25], %36 {strides = array<i32>} : memref<8x8xf32, #tpu.memory_space<vmem>>, vector<8x8xf32>,
    return
  }
  func.func @transform_0(%arg0: i32) -> (i32, i32) {
    %c0_i32 = arith.constant 0 : i32
    %c0_i32_0 = arith.constant 0 : i32
    return %arg0, %c0_i32 : i32, i32
  }
  func.func @transform_1(%arg0: i32) -> (i32, i32) {
    %c0_i32 = arith.constant 0 : i32
    %c0_i32_0 = arith.constant 0 : i32
    %c0_i32_1 = arith.constant 0 : i32
    return %c0_i32, %c0_i32_0 : i32, i32
  }
  func.func @transform_2(%arg0: i32) -> (i32, i32) {
    %c0_i32 = arith.constant 0 : i32
    %c0_i32_0 = arith.constant 0 : i32
    %c0_i32_1 = arith.constant 0 : i32
    return %c0_i32, %c0_i32_0 : i32, i32
  }
  func.func @transform_3(%arg0: i32) -> (i32, i32) {
    %c0_i32 = arith.constant 0 : i32
    %c0_i32_0 = arith.constant 0 : i32
    %c0_i32_1 = arith.constant 0 : i32
    return %c0_i32, %c0_i32_0 : i32, i32
  }
  func.func @transform_4(%arg0: i32) -> (i32, i32) {
    %c0_i32 = arith.constant 0 : i32
    %c0_i32_0 = arith.constant 0 : i32
    %c0_i32_1 = arith.constant 0 : i32
    return %c0_i32, %c0_i32_0 : i32, i32
  }
  func.func @transform_5(%arg0: i32) -> (i32, i32) {
    %c0_i32 = arith.constant 0 : i32
    %c0_i32_0 = arith.constant 0 : i32
    %c0_i32_1 = arith.constant 0 : i32
    return %c0_i32, %c0_i32_0 : i32, i32
  }
  func.func @transform_6(%arg0: i32) -> (i32, i32) {
    %c0_i32 = arith.constant 0 : i32
    %c0_i32_0 = arith.constant 0 : i32
    %c0_i32_1 = arith.constant 0 : i32
    return %c0_i32, %c0_i32_0 : i32, i32
  }
  func.func @transform_7(%arg0: i32) -> (i32, i32) {
    %c0_i32 = arith.constant 0 : i32
    %c0_i32_0 = arith.constant 0 : i32
    %c0_i32_1 = arith.constant 0 : i32
    return %c0_i32, %c0_i32_0 : i32, i32
  }
  func.func @transform_8(%arg0: i32) -> (i32, i32) {
    %c0_i32 = arith.constant 0 : i32
    %c0_i32_0 = arith.constant 0 : i32
    %c0_i32_1 = arith.constant 0 : i32
    return %c0_i32, %c0_i32_0 : i32, i32
  }
  func.func @transform_9(%arg0: i32) -> (i32, i32) {
    %c0_i32 = arith.constant 0 : i32
    %c0_i32_0 = arith.constant 0 : i32
    %c0_i32_1 = arith.constant 0 : i32
    return %c0_i32, %c0_i32_0 : i32, i32
  }
  func.func @transform_10(%arg0: i32) -> (i32, i32) {
    %c0_i32 = arith.constant 0 : i32
    %c0_i32_0 = arith.constant 0 : i32
    return %arg0, %c0_i32 : i32, i32
  }
}

</mosaic_0001>

<bundles_post_ra>
// kernel: tpu_custom_call.1
= control target key start
LH: loop header
LB: loop body
LE: loop exit
PB: predicated region body
PF: predicated region fallthrough
CT: control target
= control target key end

     0   :  { %15 = vsyncpa [#allocation3], 0  ;;  %s1446_s0 = inlined_call_operand.vmem [shape: f32[16,2], index: 0, kind: input, shape index: {}]   ;;  %s1447_s1 = inlined_call_operand.vmem [shape: f32[1,128], index: 1, kind: input, shape index: {}]   ;;  %s1448_s2 = inlined_call_operand.vmem [shape: f32[1,128], index: 2, kind: input, shape index: {}]   ;;  %s1449_s3 = inlined_call_operand.vmem [shape: f32[1,128], index: 3, kind: input, shape index: {}]   ;;  %s1450_s4 = inlined_call_operand.hbm [shape: f32[128,128], index: 4, kind: input, shape index: {}]   ;;  %s1451_s5 = inlined_call_operand.vmem [shape: f32[1,128], index: 5, kind: input, shape index: {}]   ;;  %s1452_s6 = inlined_call_operand.hbm [shape: f32[128,128], index: 6, kind: input, shape index: {}]   ;;  %s1453_s7 = inlined_call_operand.vmem [shape: f32[1,128], index: 7, kind: input, shape index: {}]   ;;  %s1454_s8 = inlined_call_operand.hbm [shape: f32[128,128], index: 8, kind: input, shape index: {}]   ;;  %s1455_s9 = inlined_call_operand.vmem [shape: f32[1,128], index: 9, kind: input, shape index: {}]   ;;  %s1456_s10 = inlined_call_operand.vmem [shape: f32[16,8], index: 10, kind: output, shape index: {}]  }
   0x1   :  { %16 = vsyncpa [#allocation5], 0  ;;  %s1264_s13 = smov 0  }
   0x2 LB: > { %s1270_s14 = sadd.s32 4294967295, %s1197_s13   ;;  %p804_p0 = scmp.ge.s32.totalorder %s1197_s13, 1  ;;  %s1197_s13 = sphi %s1264_s13, %s22_s13  }
   0x3   : > { %p268_p1 = scmp.lt.s32.totalorder %s1197_s13, 3  ;;  %p1457_p2 = scmp.eq.s32.totalorder %s1270_s14, 0 }
   0x4   : > { %s1199_s16 = smov [#allocation4]   ;;  %s1200_s18 = smov [#allocation2]  }
   0x5   : > { %p1275_p3 = pnand %p804_p0, %p268_p1  ;;  %s305_s17 = sshll.u32 %s1199_s16, 4  ;;  %s306_s17 = int_to_ptr.vmem [resolvable:$true] %s305_s17 }
   0x6   : > { %s289_s19 = sshll.u32 %s1200_s18, 4  ;;  %s1201_s21 = smov [#allocation6]   ;;  %s1287_s19 = int_to_ptr.vmem [resolvable:$true] %s289_s19 }
   0x7   : > { %s1459_s15 = scalar_select %p1275_p3, 1, 0 }
   0x8   : > { %p1063_p4 = pneg %p1275_p3  ;;  %s321_s22 = sshll.u32 %s1201_s21, 4  ;;  %s1289_s22 = int_to_ptr.vmem [resolvable:$true] %s321_s22 }
   0x9   : > { %s1099_s25 = scalar_lea.hbm %s1452_s6, 2048 }
   0xa   : > { %p1283_p5 = pnand %p1457_p2, %p1063_p4  ;;  %p1100_p6 = scmp.ne.s32.totalorder %s1452_s6, %s1099_s25 }
   0xb   : > { %p1106_p10 = scmp.lt.u32.totalorder %s1099_s25, %s1452_s6 }
   0xc   : > { %p1299_p7 = pneg %p1283_p5 }
   0xe   : > { %p1102_p8 = pnand %p1299_p7, %p1100_p6 }
  0x10   : > { %p1103_p9 = pneg %p1102_p8 }
  0x12   : > { %p1108_p11 = pnand %p1106_p10, %p1103_p9 }
  0x14   : > { %1111 = shalt.err (!%p1108_p11)
}
  0x15   : > { %s1112_s11 = scalar_lea.vmem %s306_s17, 2048  ;;  %p1120_p1 = scmp.lt.s32.totalorder %s306_s17, %s306_s17 }
  0x16   : > { %p1113_p12 = scmp.ne.s32.totalorder %s306_s17, %s1112_s11  ;;  %p1121_p4 = scmp.lt.s32.totalorder %s1112_s11, %s1112_s11 }
  0x18   : > { %p1115_p13 = pnand %p1113_p12, %p1299_p7  ;;  %p1122_p2 = por %p1121_p4, %p1120_p1 }
  0x1a   : > { %p1116_p0 = pneg %p1115_p13 }
  0x1c   : > { %p1123_p3 = pnand %p1122_p2, %p1116_p0 }
  0x1e   : > { %1126 = shalt.err (!%p1123_p3)
}
  0x1f   : > { %s1202_s12 = smov 128   ;;  %s1203_s16 = smov 8  }
  0x20   : > { %1069 = dma.hbm_to_vmem [thread:$0]  (!%p1283_p5), %s1452_s6, 2048, %s306_s17, [#allocation5], %s1202_s12, %s1202_s12, %s1203_s16  }
  0x21   : > { %s1127_s25 = scalar_lea.hbm %s1450_s4, 2048 }
  0x22   : > { %p1128_p2 = scmp.ne.s32.totalorder %s1450_s4, %s1127_s25  ;;  %p1134_p8 = scmp.lt.u32.totalorder %s1127_s25, %s1450_s4 }
  0x24   : > { %p1130_p3 = pnand %p1128_p2, %p1299_p7 }
  0x26   : > { %p1131_p6 = pneg %p1130_p3 }
  0x28   : > { %p1136_p9 = pnand %p1134_p8, %p1131_p6 }
  0x2a   : > { %1139 = shalt.err (!%p1136_p9)
}
  0x2b   : > { %s1140_s17 = scalar_lea.vmem %s1287_s19, 2048  ;;  %p1148_p13 = scmp.lt.s32.totalorder %s1287_s19, %s1287_s19 }
  0x2c   : > { %p1141_p10 = scmp.ne.s32.totalorder %s1287_s19, %s1140_s17  ;;  %p1149_p0 = scmp.lt.s32.totalorder %s1140_s17, %s1140_s17 }
  0x2e   : > { %p1143_p11 = pnand %p1141_p10, %p1299_p7  ;;  %p1150_p1 = por %p1149_p0, %p1148_p13 }
  0x30   : > { %p1144_p12 = pneg %p1143_p11 }
  0x32   : > { %p1151_p4 = pnand %p1150_p1, %p1144_p12 }
  0x34   : > { %1154 = shalt.err (!%p1151_p4)
}
  0x35   : > { %1066 = dma.hbm_to_vmem [thread:$0]  (!%p1283_p5), %s1450_s4, 2048, %s1287_s19, [#allocation3], %s1202_s12, %s1202_s12, %s1203_s16  }
  0x36   : > { %s1155_s24 = scalar_lea.hbm %s1454_s8, 2048 }
  0x37   : > { %p1156_p2 = scmp.ne.s32.totalorder %s1454_s8, %s1155_s24  ;;  %p1162_p8 = scmp.lt.u32.totalorder %s1155_s24, %s1454_s8 }
  0x39   : > { %p1158_p3 = pnand %p1156_p2, %p1299_p7 }
  0x3b   : > { %p1159_p6 = pneg %p1158_p3 }
  0x3d   : > { %p1164_p9 = pnand %p1162_p8, %p1159_p6 }
  0x3f   : > { %1167 = shalt.err (!%p1164_p9)
}
  0x40   : > { %s1168_s19 = scalar_lea.vmem %s1289_s22, 2048  ;;  %p1176_p13 = scmp.lt.s32.totalorder %s1289_s22, %s1289_s22 }
  0x41   : > { %p1169_p10 = scmp.ne.s32.totalorder %s1289_s22, %s1168_s19  ;;  %p1177_p0 = scmp.lt.s32.totalorder %s1168_s19, %s1168_s19 }
  0x43   : > { %p1171_p11 = pnand %p1169_p10, %p1299_p7  ;;  %p1178_p1 = por %p1177_p0, %p1176_p13 }
  0x45   : > { %p1172_p12 = pneg %p1171_p11 }
  0x47   : > { %p1179_p4 = pnand %p1178_p1, %p1172_p12 }
  0x49   : > { %1182 = shalt.err (!%p1179_p4)
}
  0x4a   : > { %1072 = dma.hbm_to_vmem [thread:$0]  (!%p1283_p5), %s1454_s8, 2048, %s1289_s22, [#allocation5], %s1202_s12, %s1202_s12, %s1203_s16  }
  0x4b   : > { %p1462_p2 = scmp.ne.s32.totalorder %s1459_s15, 0 }
  0x4c   : > { %p1463_p7 = scmp.eq.s32.totalorder (!%p1462_p2), %s1270_s14, 0 }
  0x4d   : > { %347 = sbr.rel (%p1462_p2) target bundleno = 883 (0x373), region = 60 }
  0x54   : > { %1188 = dma.done.wait (%p1463_p7), [#allocation3], 2048   ;;  %p1464_p3 = pmov %p1463_p7 }
  0x56   : > { %1190 = vsyncadd (%p1464_p3), [#allocation3], 4294965248  ;;  %p1465_p6 = pmov %p1464_p3 }
  0x57   : > { %p1466_p8 = pmov %p1464_p3 }
  0x58   : > { %1192 = dma.done.wait (%p1465_p6), [#allocation5], 4096  }
  0x59   : > { %1194 = vsyncadd (%p1466_p8), [#allocation5], 4294963200  ;;  %p391_p9 = scmp.lt.s32.totalorder %s1270_s14, 1  ;;  %v1204_v0 = vmov 0   ;;  %v1205_v1 = vmov 0.0|0.0   ;;  %v435_v3 = vld [vmem:[#allocation2] sm:$0xff] }
  0x5a   : > { %1097 = vset.pattern.permute.xlu0 %v1204_v0  ;;  %979 = vmatprep.subr.bf16.mxu0 %v1205_v1  ;;  %v436_v4 = vld [vmem:[#allocation2 + $0x8] sm:$0xff]  ;;  %v437_v6 = vld [vmem:[#allocation2 + $0x10] sm:$0xff]  ;;  %v438_v7 = vld [vmem:[#allocation2 + $0x18] sm:$0xff]  ;;  %v1206_v11 = vmov 1   ;;  %vm1207_vm0 = vmmov 0   ;;  %v1208_v15 = vmov 0.0  }
  0x5b   : > { %s1468_s14 = smov (!%p391_p9, %s1270_s14), 1  ;;  %1003 = vmatprep.subr.bf16.mxu1 %v1205_v1  ;;  %v980_v5 = vpack.c.bf16 %v436_v4, %v435_v3  ;;  %v983_v8 = vpack.c.bf16 %v438_v7, %v437_v6  ;;  %v439_v9 = vld [vmem:[#allocation2 + $0x20] sm:$0xff]  ;;  %v440_v10 = vld [vmem:[#allocation2 + $0x28] sm:$0xff]  ;;  %v441_v13 = vld [vmem:[#allocation2 + $0x30] sm:$0xff]  ;;  %906 = vmatprep.mubr.msk.f32.mxu0 %vm1207_vm0, %v1208_v15  ;;  %vm716_vm1 = vcmask 64512  }
  0x5c   : > { %s813_s15 = sshll.u32 %s1468_s14, 3  ;;  %v986_v12 = vpack.c.bf16 %v440_v10, %v439_v9  ;;  %v442_v14 = vld [vmem:[#allocation2 + $0x38] sm:$0xff]  ;;  %941 = vmatprep.mubr.msk.f32.mxu1 %vm1207_vm0, %v1208_v15  ;;  %v443_v17 = vld [vmem:[#allocation2 + $0x40] sm:$0xff]  ;;  %v444_v18 = vld [vmem:[#allocation2 + $0x48] sm:$0xff] }
  0x5d   : > { %s394_s28 = scalar_lea.vmem %s1446_s0, %s813_s15  ;;  %981 = vmatpush3.bf16.msra.mxu0 %v980_v5  ;;  %v989_v16 = vpack.c.bf16 %v442_v14, %v441_v13  ;;  %v529_v19 = vld [vmem:[#allocation4] sm:$0xff]  ;;  %v530_v20 = vld [vmem:[#allocation4 + $0x8] sm:$0xff]  ;;  %v531_v21 = vld [vmem:[#allocation4 + $0x10] sm:$0xff]  ;;  %v992_v22 = vpack.c.bf16 %v444_v18, %v443_v17  ;;  %s398_s20 = scalar_lea.vmem %s1456_s10, %s813_s15 }
  0x5e   : > { %v399_v2 = vld [vmem:[%s394_s28] sm:$0xff]  ;;  %982 = vmatprep.subr.bf16.mxu0 %v1205_v1  ;;  %v1004_v23 = vpack.c.bf16 %v530_v20, %v529_v19  ;;  %v532_v24 = vld [vmem:[#allocation4 + $0x18] sm:$0xff]  ;;  %v445_v25 = vld [vmem:[#allocation2 + $0x50] sm:$0xff] }
  0x5f   : > { %403 = vperm.xlu0 %1097, %v399_v2   ;;  %v446_v26 = vld [vmem:[#allocation2 + $0x58] sm:$0xff]  ;;  %v1007_v27 = vpack.c.bf16 %v532_v24, %v531_v21  ;;  %v533_v28 = vld [vmem:[#allocation4 + $0x20] sm:$0xff]  ;;  %v534_v29 = vld [vmem:[#allocation4 + $0x28] sm:$0xff] }
  0x60   : > { %1005 = vmatpush3.bf16.msra.mxu1 %v1004_v23  ;;  %v995_v30 = vpack.c.bf16 %v446_v26, %v445_v25  ;;  %v447_v31 = vld [vmem:[#allocation2 + $0x60] sm:$0xff]  ;;  %v448_v32 = vld [vmem:[#allocation2 + $0x68] sm:$0xff]  ;;  %v1010_v33 = vpack.c.bf16 %v534_v29, %v533_v28  ;;  %v535_v34 = vld [vmem:[#allocation4 + $0x30] sm:$0xff] }
  0x61   : > { %984 = vmatpush3.bf16.msra.mxu0 %v983_v8  ;;  %1006 = vmatprep.subr.bf16.mxu1 %v1205_v1  ;;  %v536_v35 = vld [vmem:[#allocation4 + $0x38] sm:$0xff]  ;;  %v998_v36 = vpack.c.bf16 %v448_v32, %v447_v31  ;;  %v449_v37 = vld [vmem:[#allocation2 + $0x70] sm:$0xff]  ;;  %v537_v40 = vld [vmem:[#allocation4 + $0x40] sm:$0xff] }
  0x62   : > { %985 = vmatprep.subr.bf16.mxu0 %v1205_v1  ;;  %v450_v38 = vld [vmem:[#allocation2 + $0x78] sm:$0xff]  ;;  %v1013_v39 = vpack.c.bf16 %v536_v35, %v535_v34  ;;  %v538_v41 = vld [vmem:[#allocation4 + $0x48] sm:$0xff]  ;;  %v539_v44 = vld [vmem:[#allocation4 + $0x50] sm:$0xff] }
  0x63   : > { %1098 = vset.pattern.permute.xlu0 %v1206_v11  ;;  %v1001_v42 = vpack.c.bf16 %v450_v38, %v449_v37  ;;  %v1016_v43 = vpack.c.bf16 %v538_v41, %v537_v40  ;;  %v540_v45 = vld [vmem:[#allocation4 + $0x58] sm:$0xff]  ;;  %v541_v47 = vld [vmem:[#allocation4 + $0x60] sm:$0xff]  ;;  %v542_v48 = vld [vmem:[#allocation4 + $0x68] sm:$0xff] }
  0x64   : > { %415 = vperm.xlu0 %1098, %v399_v2   ;;  %1008 = vmatpush3.bf16.msra.mxu1 %v1007_v27  ;;  %v1019_v46 = vpack.c.bf16 %v540_v45, %v539_v44  ;;  %v1022_v49 = vpack.c.bf16 %v542_v48, %v541_v47  ;;  %v815_v51 = vld [vmem:[%s1447_s1] ss:$0 sm:$0xff]  ;;  %v543_v60 = vld [vmem:[#allocation4 + $0x70] sm:$0xff]  ;;  %v544_v61 = vld [vmem:[#allocation4 + $0x78] sm:$0xff] }
  0x65   : > { %987 = vmatpush3.bf16.msra.mxu0 %v986_v12  ;;  %1009 = vmatprep.subr.bf16.mxu1 %v1205_v1  ;;  %v816_v52 = vld [vmem:[%s1448_s2] ss:$0 sm:$0xff]  ;;  %v1025_v62 = vpack.c.bf16 %v544_v61, %v543_v60  ;;  %v624_v0 = vld [vmem:[#allocation6 + $0x8] sm:$0xff]  ;;  %v625_v2 = vld [vmem:[#allocation6 + $0x10] sm:$0xff] }
  0x66   : > { %988 = vmatprep.subr.bf16.mxu0 %v1205_v1  ;;  %v817_v56 = vld [vmem:[%s1449_s3] ss:$0 sm:$0xff]  ;;  %v626_v4 = vld [vmem:[#allocation6 + $0x18] sm:$0xff]  ;;  %v628_v7 = vld [vmem:[#allocation6 + $0x28] sm:$0xff] }
  0x67   : > { %v623_v63 = vld [vmem:[#allocation6] sm:$0xff]  ;;  %v1031_v5 = vpack.c.bf16 %v626_v4, %v625_v2  ;;  %v629_v9 = vld [vmem:[#allocation6 + $0x30] sm:$0xff]  ;;  %v630_v10 = vld [vmem:[#allocation6 + $0x38] sm:$0xff] }
  0x68   : > { %1011 = vmatpush3.bf16.msra.mxu1 %v1010_v33  ;;  %v1028_v3 = vpack.c.bf16 %v624_v0, %v623_v63  ;;  %v627_v6 = vld [vmem:[#allocation6 + $0x20] sm:$0xff]  ;;  %v1037_v11 = vpack.c.bf16 %v630_v10, %v629_v9  ;;  %v632_v13 = vld [vmem:[#allocation6 + $0x48] sm:$0xff]  ;;  %v637_v26 = vld [vmem:[#allocation6 + $0x70] sm:$0xff] }
  0x69   : > { %990 = vmatpush3.bf16.msra.mxu0 %v989_v16  ;;  %1012 = vmatprep.subr.bf16.mxu1 %v1205_v1  ;;  %v1034_v8 = vpack.c.bf16 %v628_v7, %v627_v6  ;;  %v631_v12 = vld [vmem:[#allocation6 + $0x40] sm:$0xff]  ;;  %v634_v16 = vld [vmem:[#allocation6 + $0x58] sm:$0xff]  ;;  %v636_v19 = vld [vmem:[#allocation6 + $0x68] sm:$0xff] }
  0x6a   : > { %991 = vmatprep.subr.bf16.mxu0 %v1205_v1  ;;  %v1040_v14 = vpack.c.bf16 %v632_v13, %v631_v12  ;;  %v635_v18 = vld [vmem:[#allocation6 + $0x60] sm:$0xff]  ;;  %v638_v27 = vld [vmem:[#allocation6 + $0x78] sm:$0xff] }
  0x6b   : > { %v1046_v20 = vpack.c.bf16 %v636_v19, %v635_v18  ;;  %v818_v21 = vld [vmem:[%s1451_s5] ss:$0 sm:$0xff]  ;;  %v1049_v28 = vpack.c.bf16 %v638_v27, %v637_v26 }
  0x6c   : > { %1014 = vmatpush3.bf16.msra.mxu1 %v1013_v39  ;;  %v819_v29 = vld [vmem:[%s1453_s7] ss:$0 sm:$0xff] }
  0x6d   : > { %993 = vmatpush3.bf16.msra.mxu0 %v992_v22  ;;  %1015 = vmatprep.subr.bf16.mxu1 %v1205_v1  ;;  %v820_v33 = vld [vmem:[%s1455_s9] ss:$0 sm:$0xff] }
  0x6e   : > { %994 = vmatprep.subr.bf16.mxu0 %v1205_v1 }
  0x70   : > { %1017 = vmatpush3.bf16.msra.mxu1 %v1016_v43 }
  0x71   : > { %996 = vmatpush3.bf16.msra.mxu0 %v995_v30  ;;  %1018 = vmatprep.subr.bf16.mxu1 %v1205_v1 }
  0x72   : > { %997 = vmatprep.subr.bf16.mxu0 %v1205_v1 }
  0x74   : > { %1020 = vmatpush3.bf16.msra.mxu1 %v1019_v46 }
  0x75   : > { %999 = vmatpush3.bf16.msra.mxu0 %v998_v36  ;;  %1021 = vmatprep.subr.bf16.mxu1 %v1205_v1 }
  0x76   : > { %1000 = vmatprep.subr.bf16.mxu0 %v1205_v1 }
  0x78   : > { %1023 = vmatpush3.bf16.msra.mxu1 %v1022_v49 }
  0x79   : > { %1002 = vmatpush3.bf16.msra.mxu0 %v1001_v42  ;;  %1024 = vmatprep.subr.bf16.mxu1 %v1205_v1 }
  0x7a   : > { %1027 = vmatprep.subr.bf16.mxu0 %v1205_v1 }
  0x7c   : > { %1026 = vmatpush3.bf16.msra.mxu1 %v1025_v62 }
  0xde   : > { %v404_v50 = vpop.permute.xlu0 %403 }
  0xdf   : > { %v412_v54 = vmul.f32 %v815_v51, %v404_v50 }
  0xe3   : > { %v416_v53 = vpop.permute.xlu0 %415 }
  0xe4   : > { %v424_v55 = vmul.f32 %v816_v52, %v416_v53 }
  0xe6   : > { %v425_v57 = vadd.f32 %v424_v55, %v412_v54 }
  0xe8   : > { %v433_v58 = vadd.f32 %v817_v56, %v425_v57 }
  0xea   : > { %v434_v59 = vmax.f32 %v433_v58, 0.0 }
  0xec   : > { %907 = vmatmul.mubr.f32.vlgmr.msra.gmra.mrb[0].mxu0 %v434_v59 }
  0xed   : > { %976 = vmatprep.mubr.msk.f32.mxu0 %vm1207_vm0, %v1208_v15  ;;  %1029 = vmatpush3.bf16.msra.mxu0 %v1028_v3  ;;  %v633_v15 = vld [vmem:[#allocation6 + $0x50] sm:$0xff] }
  0xee   : > { %1030 = vmatprep.subr.bf16.mxu0 %v1205_v1  ;;  %v1043_v17 = vpack.c.bf16 %v634_v16, %v633_v15 }
  0xf1   : > { %1032 = vmatpush3.bf16.msra.mxu0 %v1031_v5 }
  0xf2   : > { %1033 = vmatprep.subr.bf16.mxu0 %v1205_v1 }
  0xf5   : > { %1035 = vmatpush3.bf16.msra.mxu0 %v1034_v8 }
  0xf6   : > { %1036 = vmatprep.subr.bf16.mxu0 %v1205_v1 }
  0xf9   : > { %1038 = vmatpush3.bf16.msra.mxu0 %v1037_v11 }
  0xfa   : > { %1039 = vmatprep.subr.bf16.mxu0 %v1205_v1 }
  0xfd   : > { %1041 = vmatpush3.bf16.msra.mxu0 %v1040_v14 }
  0xfe   : > { %1042 = vmatprep.subr.bf16.mxu0 %v1205_v1 }
 0x101   : > { %1044 = vmatpush3.bf16.msra.mxu0 %v1043_v17 }
 0x102   : > { %1045 = vmatprep.subr.bf16.mxu0 %v1205_v1 }
 0x105   : > { %1047 = vmatpush3.bf16.msra.mxu0 %v1046_v20 }
 0x106   : > { %1048 = vmatprep.subr.bf16.mxu0 %v1205_v1 }
 0x109   : > { %1050 = vmatpush3.bf16.msra.mxu0 %v1049_v28 }
 0x1bf   : > { %v524_v22 = vpop.f32.mrb[0].mxu0 }
 0x1c0   : > { %v525_v23 = vadd.f32 %v818_v21, %v524_v22  ;;  %v908_v24 = vpop.f32.mrb[1].mxu0 }
 0x1c2   : > { %v528_v25 = vmax.f32 %v525_v23, 0.0 }
 0x1c4   : > { %942 = vmatmul.mubr.f32.vlgmr.msra.gmra.mrb[0].mxu1 %v528_v25 }
 0x297   : > { %v618_v30 = vpop.f32.mrb[0].mxu1 }
 0x298   : > { %v619_v1 = vadd.f32 %v819_v29, %v618_v30  ;;  %v943_v31 = vpop.f32.mrb[1].mxu1 }
 0x29a   : > { %v622_v32 = vmax.f32 %v619_v1, 0.0 }
 0x29c   : > { %977 = vmatmul.mubr.f32.vlgmr.msra.gmra.mrb[2].mxu0 %v622_v32 }
 0x36f   : > { %v712_v34 = vpop.f32.mrb[2].mxu0 }
 0x370   : > { %v713_v35 = vadd.f32 %v820_v33, %v712_v34  ;;  %v978_v36 = vpop.f32.mrb[3].mxu0 }
 0x372   : > { %717 = vst.msk [vmem:[%s398_s20] sm:$0xff] %vm716_vm1, %v713_v35 }
 0x373 PF: > { %s22_s13 = sadd.s32 1, %s1197_s13  }
 0x374   : > { %p19_p5 = scmp.ge.s32.totalorder %s22_s13, 4  }
 0x376   :  { %21 = sbr.rel (!%p19_p5) target bundleno = 2 (0x2), region = 103 }
 0x37d   :  { %737 = vsyncpa [#allocation3], 1 }
 0x37e   :  { %739 = vsyncpa [#allocation3 + $0x1], 1 }
 0x37f   :  { %740 = vsyncpa [#allocation5], 1 }

</bundles_post_ra>
